<compile_context>
chip_gen: v7x
topology: tpu7x:2x2x1
jax: 0.10.0
libtpu: 0.0.40
codegen_flags: <defaults>
</compile_context>

<pallas_src>
import jax
import jax.numpy as jnp
from functools import partial
from jax.experimental import pallas as pl
from jax.experimental.pallas import tpu as pltpu


def linear_kernel(x_ref, w_ref, b_ref, o_ref):
    # x_ref: (B, IN) VMEM   w_ref: (1, IN) VMEM   b_ref: (1, 1) SMEM   o_ref: (B, 1) VMEM
    x = x_ref[...]                      # (B, IN) f32
    w = w_ref[...]                      # (1, IN) f32, broadcasts over batch
    b = b_ref[0, 0]                     # scalar bias from SMEM
    # VPU multiply + XLU lane-reduce; result is (B, 1).
    y = jnp.sum(x * w, axis=-1, keepdims=True) + b
    o_ref[...] = y                      # OUT=1 -> masked store; negligible at this size.


@jax.jit
def linear_forward(x, weight, bias):
    B, _ = x.shape
    OUT = weight.shape[0]
    bias_smem = bias.reshape(1, 1)      # (1, 1) scalar for SMEM
    return pl.pallas_call(
        linear_kernel,
        out_shape=jax.ShapeDtypeStruct((B, OUT), x.dtype),
        in_specs=[
            pl.BlockSpec(memory_space=pltpu.MemorySpace.VMEM),   # x: whole array
            pl.BlockSpec(memory_space=pltpu.MemorySpace.VMEM),   # weight
            pl.BlockSpec(memory_space=pltpu.MemorySpace.SMEM),   # bias scalar
        ],
        out_specs=pl.BlockSpec(memory_space=pltpu.MemorySpace.VMEM),
    )(x, weight, bias_smem)


if __name__ == "__main__":
    key = jax.random.PRNGKey(0)
    kx, kw, kb = jax.random.split(key, 3)

    # Inputs consistent with the module: x = torch.randn(2, 3)
    x = jax.random.normal(kx, (2, 3), dtype=jnp.float32)

    # Deterministic params matching nn.Linear(3, 1) shapes and PyTorch-style init.
    bound = 1.0 / (3.0 ** 0.5)
    weight = jax.random.uniform(kw, (1, 3), dtype=jnp.float32, minval=-bound, maxval=bound)
    bias = jax.random.uniform(kb, (1,), dtype=jnp.float32, minval=-bound, maxval=bound)

    y = linear_forward(x, weight, bias)
    jax.block_until_ready(y)

    # Correctness check against plain JAX reference.
    y_ref = x @ weight.T + bias
    assert y.shape == (2, 1)
    assert jnp.allclose(y, y_ref, atol=1e-5), (y, y_ref)

    print("KERNEL_OK")
</pallas_src>

<mosaic_0001>
module attributes {stable_mosaic.version = 11 : i64} {
  func.func @linear_kernel(%arg0: memref<2x3xf32, #tpu.memory_space<vmem>>, %arg1: memref<1x3xf32, #tpu.memory_space<vmem>>, %arg2: memref<1x1xf32, #tpu.memory_space<smem>>, %arg3: memref<2x1xf32, #tpu.memory_space<vmem>>) attributes {dimension_semantics = [], scalar_prefetch = 0 : i64, scratch_operands = 0 : i64, tpu.core_type = #tpu.core_type<tc>} {
    %c0 = arith.constant 0 : index
    %c0_0 = arith.constant 0 : index
    %0 = vector.load %arg0[%c0, %c0_0] : memref<2x3xf32, #tpu.memory_space<vmem>>, vector<2x3xf32>
    %c0_1 = arith.constant 0 : index
    %c0_2 = arith.constant 0 : index
    %1 = vector.load %arg1[%c0_1, %c0_2] : memref<1x3xf32, #tpu.memory_space<vmem>>, vector<1x3xf32>
    %c0_3 = arith.constant 0 : index
    %c0_4 = arith.constant 0 : index
    %2 = memref.load %arg2[%c0_3, %c0_4] : memref<1x1xf32, #tpu.memory_space<smem>>
    %3 = vector.broadcast %1 : vector<1x3xf32> to vector<2x3xf32>
    %4 = arith.mulf %0, %3 : vector<2x3xf32>
    %cst = arith.constant dense<0.000000e+00> : vector<2xf32>
    %5 = vector.multi_reduction <add>, %4, %cst [1] : vector<2x3xf32> to vector<2xf32>
    %6 = vector.shape_cast %5 : vector<2xf32> to vector<2x1xf32>
    %7 = vector.broadcast %2 : f32 to vector<2x1xf32>
    %8 = arith.addf %6, %7 : vector<2x1xf32>
    %c0_5 = arith.constant 0 : index
    %c0_6 = arith.constant 0 : index
    %9 = vector.load %arg3[%c0_5, %c0_6] : memref<2x1xf32, #tpu.memory_space<vmem>>, vector<2x1xf32>
    tpu.vector_store %arg3[%c0_5, %c0_6], %8 {strides = array<i32>} : memref<2x1xf32, #tpu.memory_space<vmem>>, vector<2x1xf32>,
    return
  }
}

</mosaic_0001>

<bundles_post_ra>
// kernel: linear_forward.1
= control target key start
LH: loop header
LB: loop body
LE: loop exit
PB: predicated region body
PF: predicated region fallthrough
CT: control target
= control target key end

     0   :  { %vm25_vm0 = vcmask 17408   ;;  %vm31_vm1 = vcmask 1024   ;;  %s70_s0 = inlined_call_operand.vmem [shape: f32[2,3], index: 0, kind: input, shape index: {}]   ;;  %s71_s1 = inlined_call_operand.vmem [shape: f32[1,3], index: 1, kind: input, shape index: {}]   ;;  %s72_s2 = inlined_call_operand.<no memory space> [shape: f32[1,1], index: 2, kind: input, shape index: {}]   ;;  %s73_s3 = inlined_call_operand.vmem [shape: f32[2,1], index: 3, kind: output, shape index: {}]  }
   0x1   :  { %v15_v0 = vld [vmem:[%s70_s0] sm:$0x3]  ;;  %v29_v4 = vstv %s72_s2 }
   0x2   :  { %v37_v1 = vld [vmem:[%s71_s1] ss:$0 sm:$0xff] }
   0x3   :  { %v24_v2 = vmul.f32 %v37_v1, %v15_v0 }
   0x5   :  { %v26_v3 = vsel %vm25_vm0, %v24_v2, 0.0 }
   0x6   :  { %27 = vadd.xlane.f32.xlu0 %v26_v3 }
  0x93   :  { %v28_v5 = vpop.xlane.xlu0 %27 }
  0x94   :  { %v30_v6 = vadd.f32 %v29_v4, %v28_v5 }
  0x96   :  { %32 = vst.msk [vmem:[%s73_s3] sm:$0x3] %vm31_vm1, %v30_v6 }

</bundles_post_ra>
